<compile_context>
chip_gen: v5e
topology: v5e:2x2
jax: 0.10.0
libtpu: 0.0.40
codegen_flags: <defaults>
</compile_context>

<pallas_src>
import numpy as np
import jax
import jax.numpy as jnp
from jax import lax
from jax.experimental import pallas as pl
from jax.experimental.pallas import tpu as pltpu

_EPS = 1e-5  # PyTorch InstanceNorm default eps


# ----------------------------------------------------------------------------
# pltpu.roll direction probe (one tiny eager kernel; removes any ambiguity in
# the rotate convention so the shifted-matmul conv is correct either way).
# ----------------------------------------------------------------------------
_ROLL_SIGN = None


def _roll_sign():
    global _ROLL_SIGN
    if _ROLL_SIGN is None:
        x = jnp.arange(256, dtype=jnp.float32).reshape(1, 256)

        def k(x_ref, o_ref):
            o_ref[...] = pltpu.roll(x_ref[...], shift=3, axis=1)

        y = pl.pallas_call(
            k, out_shape=jax.ShapeDtypeStruct((1, 256), jnp.float32))(x)
        _ROLL_SIGN = 1 if bool(jnp.allclose(y, jnp.roll(x, 3, axis=1))) else -1
    return _ROLL_SIGN


# ----------------------------------------------------------------------------
# In-kernel helpers (traced inside the kernel bodies)
# ----------------------------------------------------------------------------
def _instance_norm(v, gamma, beta):
    """Two-pass per-channel InstanceNorm(affine) on an f32 (C, S) slab."""
    inv_s = 1.0 / v.shape[1]
    mean = jnp.sum(v, axis=1, keepdims=True) * inv_s
    cen = v - mean
    var = jnp.sum(cen * cen, axis=1, keepdims=True) * inv_s
    return cen * lax.rsqrt(var + _EPS) * gamma + beta


def _mixed_op_store(xp, ws_ref, wstk_ref, g_ref, b_ref, o_ref, taps_ref, w_sp):
    """MixedOp tail: o = ws[0]*xp + ws[1]*IN(conv3x3(relu(xp))).

    conv3x3 = ONE stacked-K bf16 MXU matmul (C,9C)x(9C,S); the nine
    rolled + boundary-masked bf16 taps are staged in a (9C,S) VMEM scratch.
    Boundary masks are generated in-kernel from iota compares.
    """
    C, S = xp.shape
    sign = _roll_sign()                           # Python int, trace-time
    a = jnp.maximum(xp, 0.0).astype(jnp.bfloat16)   # cast ONCE, shift in bf16
    col = lax.broadcasted_iota(jnp.int32, (1, S), 1)
    xq = col % w_sp                                # x coordinate of each lane
    t = 0
    for dy in (-1, 0, 1):
        for dx in (-1, 0, 1):
            d = dy * w_sp + dx
            if d == 0:
                sh = a
            else:
                sh = pltpu.roll(a, shift=(sign * -d) % S, axis=1)
                valid = None
                if dy == -1:
                    valid = col >= w_sp
                elif dy == 1:
                    valid = col < (S - w_sp)
                if dx == -1:
                    vx = xq >= 1
                    valid = vx if valid is None else (valid & vx)
                elif dx == 1:
                    vx = xq < (w_sp - 1)
                    valid = vx if valid is None else (valid & vx)
                sh = sh * valid.astype(jnp.bfloat16)
            taps_ref[t * C:(t + 1) * C, :] = sh
            t += 1
    conv = jnp.dot(wstk_ref[...], taps_ref[...],
                   preferred_element_type=jnp.float32)
    cell = _instance_norm(conv, g_ref[...], b_ref[...])
    o_ref[0] = (ws_ref[0] * xp + ws_ref[1] * cell).astype(o_ref.dtype)


def _cparams(pipelined_bytes, resident_bytes, temp_bytes):
    """VMEM budget: 2x pipelined blocks + single-buffered constants/scratch +
    in-kernel temporaries + margin; clamped to 48 MiB (v7x has 64 MiB)."""
    vmem = 2 * int(pipelined_bytes) + int(resident_bytes) + int(temp_bytes)
    vmem += 2 << 20
    vmem = int(min(max(vmem, 8 << 20), 48 << 20))
    return pltpu.CompilerParams(dimension_semantics=("parallel",),
                                vmem_limit_bytes=vmem)


_CONST = pl.Buffered(1)  # single-buffer operands whose block index is fixed


# ----------------------------------------------------------------------------
# Fused per-cell Pallas kernels (preprocess + MixedOp in a single pallas_call)
# ----------------------------------------------------------------------------
def _cell_identity(ws, x, wstk, gamma, beta, w_sp):
    """identity preprocess + MixedOp.  x: (B, C, S) bf16."""
    B, C, S = x.shape

    def kernel(ws_ref, x_ref, wstk_ref, g_ref, b_ref, o_ref, taps_ref):
        xp = x_ref[0].astype(jnp.float32)
        _mixed_op_store(xp, ws_ref, wstk_ref, g_ref, b_ref, o_ref, taps_ref,
                        w_sp)

    pipelined = 2 * C * S * 2                     # x in + out, both bf16
    resident = 9 * C * C * 2 + 2 * C * 4 + 9 * C * S * 2
    temps = 6 * C * S * 4
    return pl.pallas_call(
        kernel,
        out_shape=jax.ShapeDtypeStruct((B, C, S), jnp.bfloat16),
        grid=(B,),
        in_specs=[
            pl.BlockSpec(memory_space=pltpu.MemorySpace.SMEM),      # ws (2,)
            pl.BlockSpec((1, C, S), lambda b: (b, 0, 0)),           # x bf16
            pl.BlockSpec((C, 9 * C), lambda b: (0, 0),
                         pipeline_mode=_CONST),                     # conv3x3
            pl.BlockSpec((C, 1), lambda b: (0, 0), pipeline_mode=_CONST),
            pl.BlockSpec((C, 1), lambda b: (0, 0), pipeline_mode=_CONST),
        ],
        out_specs=pl.BlockSpec((1, C, S), lambda b: (b, 0, 0)),
        scratch_shapes=[pltpu.VMEM((9 * C, S), jnp.bfloat16)],
        compiler_params=_cparams(pipelined, resident, temps),
    )(ws, x, wstk, gamma, beta)


def _cell_acn(ws, x, w_pre, g_pre, b_pre, wstk, gamma, beta, w_sp):
    """ReLU -> 1x1 conv -> IN preprocess (align_channels / post-upsample),
    fused with MixedOp.  x: (B, Cp, S) bf16."""
    B, Cp, S = x.shape
    C = w_pre.shape[0]

    def kernel(ws_ref, x_ref, wp_ref, gp_ref, bp_ref,
               wstk_ref, g_ref, b_ref, o_ref, taps_ref):
        a = jnp.maximum(x_ref[0], 0)                       # bf16 (Cp, S)
        pre = jnp.dot(wp_ref[...], a, preferred_element_type=jnp.float32)
        xp = _instance_norm(pre, gp_ref[...], bp_ref[...])
        _mixed_op_store(xp, ws_ref, wstk_ref, g_ref, b_ref, o_ref, taps_ref,
                        w_sp)

    pipelined = Cp * S * 2 + C * S * 2
    resident = C * Cp * 2 + 2 * C * 4 + 9 * C * C * 2 + 2 * C * 4 + \
        9 * C * S * 2
    temps = 6 * C * S * 4 + C * S * 4
    return pl.pallas_call(
        kernel,
        out_shape=jax.ShapeDtypeStruct((B, C, S), jnp.bfloat16),
        grid=(B,),
        in_specs=[
            pl.BlockSpec(memory_space=pltpu.MemorySpace.SMEM),
            pl.BlockSpec((1, Cp, S), lambda b: (b, 0, 0)),
            pl.BlockSpec((C, Cp), lambda b: (0, 0), pipeline_mode=_CONST),
            pl.BlockSpec((C, 1), lambda b: (0, 0), pipeline_mode=_CONST),
            pl.BlockSpec((C, 1), lambda b: (0, 0), pipeline_mode=_CONST),
            pl.BlockSpec((C, 9 * C), lambda b: (0, 0), pipeline_mode=_CONST),
            pl.BlockSpec((C, 1), lambda b: (0, 0), pipeline_mode=_CONST),
            pl.BlockSpec((C, 1), lambda b: (0, 0), pipeline_mode=_CONST),
        ],
        out_specs=pl.BlockSpec((1, C, S), lambda b: (b, 0, 0)),
        scratch_shapes=[pltpu.VMEM((9 * C, S), jnp.bfloat16)],
        compiler_params=_cparams(pipelined, resident, temps),
    )(ws, x, w_pre, g_pre, b_pre, wstk, gamma, beta)


def _cell_reduce(ws, x1, x2, w1, w2, g_pre, b_pre, wstk, gamma, beta, w_sp):
    """FactorizedReduce preprocess (ReLU -> two strided 1x1 convs -> IN),
    fused with MixedOp.  x1/x2: even/odd strided slabs (B, Cp, S) bf16."""
    B, Cp, S = x1.shape
    C1, C2 = w1.shape[0], w2.shape[0]
    C = C1 + C2

    def kernel(ws_ref, x1_ref, x2_ref, w1_ref, w2_ref, gp_ref, bp_ref,
               wstk_ref, g_ref, b_ref, o_ref, taps_ref):
        a1 = jnp.maximum(x1_ref[0], 0)
        a2 = jnp.maximum(x2_ref[0], 0)
        c1 = jnp.dot(w1_ref[...], a1, preferred_element_type=jnp.float32)
        c2 = jnp.dot(w2_ref[...], a2, preferred_element_type=jnp.float32)
        pre = jnp.concatenate([c1, c2], axis=0)            # (C, S) f32
        xp = _instance_norm(pre, gp_ref[...], bp_ref[...])
        _mixed_op_store(xp, ws_ref, wstk_ref, g_ref, b_ref, o_ref, taps_ref,
                        w_sp)

    pipelined = 2 * Cp * S * 2 + C * S * 2
    resident = C * Cp * 2 + 2 * C * 4 + 9 * C * C * 2 + 2 * C * 4 + \
        9 * C * S * 2
    temps = 6 * C * S * 4 + 2 * C * S * 4
    return pl.pallas_call(
        kernel,
        out_shape=jax.ShapeDtypeStruct((B, C, S), jnp.bfloat16),
        grid=(B,),
        in_specs=[
            pl.BlockSpec(memory_space=pltpu.MemorySpace.SMEM),
            pl.BlockSpec((1, Cp, S), lambda b: (b, 0, 0)),
            pl.BlockSpec((1, Cp, S), lambda b: (b, 0, 0)),
            pl.BlockSpec((C1, Cp), lambda b: (0, 0), pipeline_mode=_CONST),
            pl.BlockSpec((C2, Cp), lambda b: (0, 0), pipeline_mode=_CONST),
            pl.BlockSpec((C, 1), lambda b: (0, 0), pipeline_mode=_CONST),
            pl.BlockSpec((C, 1), lambda b: (0, 0), pipeline_mode=_CONST),
            pl.BlockSpec((C, 9 * C), lambda b: (0, 0), pipeline_mode=_CONST),
            pl.BlockSpec((C, 1), lambda b: (0, 0), pipeline_mode=_CONST),
            pl.BlockSpec((C, 1), lambda b: (0, 0), pipeline_mode=_CONST),
        ],
        out_specs=pl.BlockSpec((1, C, S), lambda b: (b, 0, 0)),
        scratch_shapes=[pltpu.VMEM((9 * C, S), jnp.bfloat16)],
        compiler_params=_cparams(pipelined, resident, temps),
    )(ws, x1, x2, w1, w2, g_pre, b_pre, wstk, gamma, beta)


# ----------------------------------------------------------------------------
# Host-side constants: align_corners 2x upsample matrices
# ----------------------------------------------------------------------------
def _upsample_mats(H, W):
    """nn.Upsample(scale_factor=2, mode='bilinear', align_corners=True) as
    left/right interpolation matrices: xu = U_h @ x @ U_w^T (per channel)."""
    def mat(n):
        m = np.zeros((2 * n, n), np.float32)
        if n == 1:
            m[:, 0] = 1.0
            return m
        for o in range(2 * n):
            c = o * (n - 1) / (2 * n - 1)
            lo = int(np.floor(c))
            hi = min(lo + 1, n - 1)
            w = c - lo
            m[o, lo] += 1.0 - w
            m[o, hi] += w
        return m
    return jnp.asarray(mat(H)), jnp.asarray(mat(W))


def _upsample2x(x_bf16, Uh, Uw):
    """bf16 inputs, default precision, f32 accumulation (result is consumed
    as bf16 anyway).
    TODO(synk): fold Uh/Uw as extra MXU matmuls inside _cell_acn to remove
    the HBM round trip of the upsampled intermediate."""
    return jnp.einsum("yh,bchw,xw->bcyx", Uh.astype(jnp.bfloat16), x_bf16,
                      Uw.astype(jnp.bfloat16),
                      preferred_element_type=jnp.float32)


# ----------------------------------------------------------------------------
# Cell (preprocess + MixedOp), one fused pallas_call per call
# ----------------------------------------------------------------------------
class PallasCell:
    """DiNTS Cell (spatial_dims=2): preprocess + MixedOp over OPS2D =
    {skip_connect, conv_3x3}.  Conv blocks are ReLU -> Conv(bias=False) ->
    InstanceNorm(affine).  Weights are stored bf16, IN params f32."""

    def __init__(self, c_prev, c, rate, arch_code_c, key):
        self.c_prev, self.c, self.rate = c_prev, c, rate
        self.arch_code_c = np.asarray(arch_code_c, dtype=np.float32)
        _roll_sign()  # roll-direction probe, eagerly (outside any jit)
        ks = list(jax.random.split(key, 8))

        def conv_w(k, shape):
            fan_in = int(np.prod(shape[1:]))
            w = jax.random.normal(k, shape, jnp.float32) / np.sqrt(fan_in)
            return w.astype(jnp.bfloat16)

        def affine(k1, k2, ch):
            g = 1.0 + 0.1 * jax.random.normal(k1, (ch, 1), jnp.float32)
            b = 0.1 * jax.random.normal(k2, (ch, 1), jnp.float32)
            return g, b

        if rate == -1:        # FactorizedReduceBlock (down)
            g, b = affine(ks[2], ks[3], c)
            self.pre = {"w1": conv_w(ks[0], (c // 2, c_prev)),
                        "w2": conv_w(ks[1], (c - c // 2, c_prev)),
                        "gamma": g, "beta": b}
        elif rate == 1:       # FactorizedIncreaseBlock (up)
            g, b = affine(ks[2], ks[3], c)
            self.pre = {"w": conv_w(ks[0], (c, c_prev)), "gamma": g, "beta": b}
        elif c_prev == c:     # identity
            self.pre = None
        else:                 # align_channels: ActiConvNorm 1x1, pad 0
            g, b = affine(ks[2], ks[3], c)
            self.pre = {"w": conv_w(ks[0], (c, c_prev)), "gamma": g, "beta": b}

        g, b = affine(ks[5], ks[6], c)
        w3 = conv_w(ks[4], (c, c, 3, 3))                      # OIHW, bf16
        w9 = jnp.transpose(w3, (2, 3, 0, 1)).reshape(9, c, c)  # (tap, O, I)
        # Stacked-K layout: wstk[o, t*C + i] = w9[t, o, i]  -> (C, 9C)
        wstk = jnp.transpose(w9, (1, 0, 2)).reshape(c, 9 * c)
        self.op = {"w3": w3, "wstk": wstk, "gamma": g, "beta": b}

    def __call__(self, x, weight):
        x = jnp.asarray(x, jnp.bfloat16)
        B, Cp, H, W = x.shape
        # MixedOp: an op disabled by arch_code_c contributes exactly 0
        # (_CloseWithRAMCost returns 0.0) == masking its weight.
        ws = (jnp.asarray(weight, jnp.float32)
              * jnp.asarray(self.arch_code_c, jnp.float32))

        if self.rate == -1:
            # TODO(synk): even H/W assumed (MONAI odd-size handling not ported)
            Ho, Wo = H // 2, W // 2
            S = Ho * Wo
            x1 = x[:, :, ::2, ::2].reshape(B, Cp, S)
            x2 = x[:, :, 1::2, 1::2].reshape(B, Cp, S)
            out = _cell_reduce(ws, x1, x2, self.pre["w1"], self.pre["w2"],
                               self.pre["gamma"], self.pre["beta"],
                               self.op["wstk"],
                               self.op["gamma"], self.op["beta"], Wo)
        elif self.rate == 1:
            Ho, Wo = 2 * H, 2 * W
            Uh, Uw = _upsample_mats(H, W)
            xu = _upsample2x(x, Uh, Uw)
            xu = xu.astype(jnp.bfloat16).reshape(B, Cp, Ho * Wo)
            out = _cell_acn(ws, xu, self.pre["w"], self.pre["gamma"],
                            self.pre["beta"], self.op["wstk"],
                            self.op["gamma"], self.op["beta"], Wo)
        elif self.pre is None:
            Ho, Wo = H, W
            out = _cell_identity(ws, x.reshape(B, Cp, H * W), self.op["wstk"],
                                 self.op["gamma"], self.op["beta"], W)
        else:
            Ho, Wo = H, W
            out = _cell_acn(ws, x.reshape(B, Cp, H * W), self.pre["w"],
                            self.pre["gamma"], self.pre["beta"],
                            self.op["wstk"],
                            self.op["gamma"], self.op["beta"], W)
        return out.reshape(B, self.c, Ho, Wo)


# ----------------------------------------------------------------------------
# TopologyConstruction
# ----------------------------------------------------------------------------
class TopologyConstruction:
    DIRECTIONS = 3

    def __init__(self, arch_code=None, channel_mul=1.0, num_blocks=6,
                 num_depths=3, spatial_dims=2, use_downsample=True, key=None):
        if spatial_dims != 2:
            # TODO(synk): 3D OPS (conv_3x3x3 / P3D factorized convs) not ported.
            raise NotImplementedError("Only spatial_dims=2 (OPS2D) is implemented.")
        self.filter_nums = [int(n * channel_mul) for n in (32, 64, 128, 256, 512)]
        self.num_blocks = num_blocks
        self.num_depths = num_depths
        self.use_downsample = use_downsample
        self.num_cell_ops = 2  # len(Cell.OPS2D)

        arch_code2in, arch_code2out = [], []
        for i in range(self.DIRECTIONS * num_depths - 2):
            arch_code2in.append((i + 1) // self.DIRECTIONS - 1 + (i + 1) % self.DIRECTIONS)
        arch_code2ops = ([-1, 0, 1] * num_depths)[1:-1]
        for m in range(num_depths):
            arch_code2out.extend([m, m, m])
        arch_code2out = arch_code2out[1:-1]
        self.arch_code2in = arch_code2in
        self.arch_code2ops = arch_code2ops
        self.arch_code2out = arch_code2out

        n_paths = len(arch_code2out)
        if arch_code is None:
            arch_code_a = np.ones((num_blocks, n_paths), dtype=np.float32)
            arch_code_c = np.ones((num_blocks, n_paths, self.num_cell_ops),
                                  dtype=np.float32)
        else:
            arch_code_a = np.asarray(arch_code[0], dtype=np.float32)
            arch_code_c = np.eye(self.num_cell_ops, dtype=np.float32)[
                np.asarray(arch_code[1], dtype=np.int64)]
        self.arch_code_a = arch_code_a
        self.arch_code_c = arch_code_c

        if key is None:
            key = jax.random.PRNGKey(0)
        # TODO(synk): batch same-shape cells into one pallas_call
        #             (grid=(num_cells, B)) at the TopologyInstance level.
        self.cell_tree = {}
        ds = int(use_downsample)
        for blk_idx in range(num_blocks):
            for res_idx in range(n_paths):
                if arch_code_a[blk_idx, res_idx] == 1:
                    ck = jax.random.fold_in(jax.random.fold_in(key, blk_idx), res_idx)
                    self.cell_tree[(blk_idx, res_idx)] = PallasCell(
                        self.filter_nums[self.arch_code2in[res_idx] + ds],
                        self.filter_nums[self.arch_code2out[res_idx] + ds],
                        self.arch_code2ops[res_idx],
                        arch_code_c[blk_idx, res_idx],
                        ck)

    def forward(self, x):
        """Base class forward is `pass` in the reference implementation."""
        return None


# ----------------------------------------------------------------------------
# Pure-JAX reference for validation (f32 math on the bf16-quantized params)
# ----------------------------------------------------------------------------
def _ref_in(x, gamma, beta):
    mean = x.mean(axis=(2, 3), keepdims=True)
    var = ((x - mean) ** 2).mean(axis=(2, 3), keepdims=True)
    return ((x - mean) / jnp.sqrt(var + _EPS)) * gamma.reshape(1, -1, 1, 1) \
        + beta.reshape(1, -1, 1, 1)


def _ref_cell(cell, x, weight):
    hp = lax.Precision.HIGHEST
    x = jnp.asarray(x, jnp.bfloat16).astype(jnp.float32)
    if cell.rate == -1:
        a = jnp.maximum(x, 0.0)
        c1 = jnp.einsum("oc,bchw->bohw", cell.pre["w1"].astype(jnp.float32),
                        a[:, :, ::2, ::2], precision=hp)
        c2 = jnp.einsum("oc,bchw->bohw", cell.pre["w2"].astype(jnp.float32),
                        a[:, :, 1::2, 1::2], precision=hp)
        xp = _ref_in(jnp.concatenate([c1, c2], axis=1),
                     cell.pre["gamma"], cell.pre["beta"])
    elif cell.rate == 1:
        Uh, Uw = _upsample_mats(x.shape[2], x.shape[3])
        xu = jnp.einsum("yh,bchw,xw->bcyx", Uh, x, Uw, precision=hp)
        a = jnp.maximum(xu, 0.0)
        xp = _ref_in(jnp.einsum("oc,bchw->bohw",
                                cell.pre["w"].astype(jnp.float32), a,
                                precision=hp),
                     cell.pre["gamma"], cell.pre["beta"])
    elif cell.pre is None:
        xp = x
    else:
        a = jnp.maximum(x, 0.0)
        xp = _ref_in(jnp.einsum("oc,bchw->bohw",
                                cell.pre["w"].astype(jnp.float32), a,
                                precision=hp),
                     cell.pre["gamma"], cell.pre["beta"])
    conv = lax.conv_general_dilated(jnp.maximum(xp, 0.0),
                                    cell.op["w3"].astype(jnp.float32),
                                    (1, 1), [(1, 1), (1, 1)],
                                    dimension_numbers=("NCHW", "OIHW", "NCHW"),
                                    precision=hp)
    convb = _ref_in(conv, cell.op["gamma"], cell.op["beta"])
    ws = jnp.asarray(weight, jnp.float32) * jnp.asarray(cell.arch_code_c)
    return ws[0] * xp + ws[1] * convb


# ----------------------------------------------------------------------------
if __name__ == "__main__":
    key = jax.random.PRNGKey(0)
    model = TopologyConstruction(arch_code=None, channel_mul=0.25, num_blocks=2,
                                 num_depths=2, spatial_dims=2,
                                 use_downsample=True, key=key)
    # Faithful base-class forward (does nothing).
    assert model.forward(None) is None

    B, H0 = 2, 32
    k0, k1, kw = jax.random.split(jax.random.PRNGKey(0), 3)
    # feature maps per resolution depth: depth d -> channels filter_nums[d+1]
    feats = {
        0: jax.random.normal(k0, (B, model.filter_nums[1], H0, H0),
                             jnp.float32).astype(jnp.bfloat16),
        1: jax.random.normal(k1, (B, model.filter_nums[2], H0 // 2, H0 // 2),
                             jnp.float32).astype(jnp.bfloat16),
    }

    outs = []
    for (blk_idx, res_idx), cell in model.cell_tree.items():
        x_in = feats[model.arch_code2in[res_idx]]
        wk = jax.random.fold_in(jax.random.fold_in(kw, blk_idx), res_idx)
        wvec = jax.nn.softmax(jax.random.normal(wk, (model.num_cell_ops,),
                                                jnp.float32))
        run = jax.jit(lambda a, w, c=cell: c(a, w))
        out = jax.block_until_ready(run(x_in, wvec))
        ref = jax.block_until_ready(_ref_cell(cell, x_in, wvec))
        np.testing.assert_allclose(np.asarray(out.astype(jnp.float32)),
                                   np.asarray(ref), rtol=5e-2, atol=5e-2)
        outs.append(out)

    jax.block_until_ready(outs)
    print("KERNEL_OK")
</pallas_src>

<mosaic_0001>
module attributes {stable_mosaic.version = 11 : i64} {
  func.func @k(%arg0: memref<1x256xf32, #tpu.memory_space<vmem>>, %arg1: memref<1x256xf32, #tpu.memory_space<vmem>>) attributes {dimension_semantics = [], scalar_prefetch = 0 : i64, scratch_operands = 0 : i64, tpu.core_type = #tpu.core_type<tc>} {
    %c0 = arith.constant 0 : index
    %c0_0 = arith.constant 0 : index
    %0 = vector.load %arg0[%c0, %c0_0] : memref<1x256xf32, #tpu.memory_space<vmem>>, vector<1x256xf32>
    %c3_i32 = arith.constant 3 : i32
    %1 = tpu.dynamic_rotate %0 by %c3_i32 dim 1 : vector<1x256xf32>, i32 -> vector<1x256xf32>
    %c0_1 = arith.constant 0 : index
    %c0_2 = arith.constant 0 : index
    %2 = vector.load %arg1[%c0_1, %c0_2] : memref<1x256xf32, #tpu.memory_space<vmem>>, vector<1x256xf32>
    tpu.vector_store %arg1[%c0_1, %c0_2], %1 {strides = array<i32>} : memref<1x256xf32, #tpu.memory_space<vmem>>, vector<1x256xf32>,
    return
  }
}

</mosaic_0001>

<bundles_post_ra>
// kernel: tpu_custom_call.1
= control target key start
LH: loop header
LB: loop body
LE: loop exit
PB: predicated region body
PF: predicated region fallthrough
CT: control target
= control target key end

     0   :  { %6 = vsyncpa [#allocation3], 0  ;;  %s140_s0 = inlined_call_operand.hbm [shape: f32[1,256], index: 0, kind: input, shape index: {}]   ;;  %s141_s1 = inlined_call_operand.hbm [shape: f32[1,256], index: 1, kind: output, shape index: {}]  }
   0x1   :  { %7 = vsyncpa [#allocation4], 0  ;;  %s13_s8 = sshll.u32 %s140_s0, 4  ;;  %s121_s9 = smov [#allocation2]   ;;  %s14_s8 = int_to_ptr.hbm [resolvable:$true] %s13_s8 }
   0x2   :  { %s15_s10 = sshll.u32 %s121_s9, 4  ;;  %s16_s10 = int_to_ptr.vmem [resolvable:$true] %s15_s10 }
   0x3   :  { %18 = dma.hbm_to_vmem [thread:$0]  %s14_s8, 32, %s16_s10, [#allocation3]  }
   0x4   :  { %117 = dma.done.wait [#allocation3], 32  }
   0x5   :  { %118 = vsyncadd [#allocation3], 4294967264  ;;  %v23_v0 = vld [vmem:[#allocation2] sm:$0x3]  ;;  %s122_s11 = smov 3   ;;  %v33_v3 = vlaneseq  ;;  %s123_s12 = smov [#allocation5]  }
   0x6   :  { %v25_v1 = vperm.slane %v23_v0, 0  ;;  %v26_v2 = vperm.slane %v23_v0, 1  ;;  %s54_s0 = sshll.u32 %s123_s12, 4  ;;  %s56_s15 = sshll.u32 %s141_s1, 4  ;;  %vm41_vm1 = vcmask 1040384   ;;  %s55_s0 = int_to_ptr.vmem [resolvable:$true] %s54_s0  ;;  %s57_s15 = int_to_ptr.hbm [resolvable:$true] %s56_s15 }
   0x7   :  { %v34_v5 = vand.u32 127, %v33_v3  ;;  %vm46_vm2 = vcmp.lt.s32.totalorder %v33_v3, 256 }
   0x8   :  { %29 = vrot.lane.b32.xlu0 %v25_v1, %s122_s11 }
   0x9   :  { %vm35_vm0 = vcmp.lt.s32.totalorder %v34_v5, 3 }
  0x10   :  { %31 = vrot.lane.b32.xlu0 %v26_v2, %s122_s11 }
  0x7a   :  { %v30_v4 = vpop.permute.xlu0 %29 }
  0x82   :  { %v32_v6 = vpop.permute.xlu0 %31 }
  0x83   :  { %v36_v7 = vsel %vm35_vm0, %v30_v4, %v32_v6  ;;  %v37_v9 = vsel %vm35_vm0, %v32_v6, %v30_v4 }
  0x84   :  { %v40_v8 = vrot.slane %v36_v7, 7 }
  0x86   :  { %v42_v10 = vsel %vm41_vm1, %v37_v9, %v40_v8 }
  0x87   :  { %48 = vst.msk [vmem:[#allocation5] sm:$0x3] %vm46_vm2, %v42_v10 }
  0x88   :  { %59 = dma.vmem_to_hbm [thread:$0]  %s55_s0, 32, %s57_s15, [#allocation4]  }
  0x89   :  { %119 = dma.done.wait [#allocation4], 32  }
  0x8a   :  { %120 = vsyncadd [#allocation4], 4294967264 }
  0x8b   :  { %64 = vsyncpa [#allocation3], 1 }
  0x8c   :  { %65 = vsyncpa [#allocation4], 1 }

</bundles_post_ra>
